<compile_context>
chip_gen: v5e
topology: v5e:2x2
jax: 0.10.0
libtpu: 0.0.40
codegen_flags: <defaults>
</compile_context>

<pallas_src>
import functools

import jax
import jax.numpy as jnp
from jax import lax
from jax.experimental import pallas as pl
from jax.experimental.pallas import tpu as pltpu


def _copy_scatter_kernel(p_gen_ref, vocab_ref, attn_ref, src_ref, out_ref, *, v_sub):
    # p_gen_ref : [n_tile, 1]       f32
    # vocab_ref : [n_tile, v_tile]  f32/bf16
    # attn_ref  : [n_tile, S]       f32/bf16   (full src extent, no padding)
    # src_ref   : [n_tile, S]       int32      (full src extent, no padding)
    # out_ref   : [n_tile, v_tile]
    n_t, v_t = out_ref.shape
    S = src_ref.shape[-1]
    v_base = pl.program_id(1) * v_t

    p_gen = p_gen_ref[...]                                          # [n_t, 1]
    attn_w = (1.0 - p_gen) * attn_ref[...].astype(jnp.float32)      # [n_t, S]
    # Subtract the vocab-tile base from the ids once (cheap, [n_t, S]) instead of
    # adding it to a full-tile iota every step.
    src0 = src_ref[...] - v_base                                    # [n_t, S] int32

    # Process the vocab tile in sub-slabs so the live f32 accumulator stays at
    # ~<= 32 vregs across the S-deep unrolled dependence chain (no spills, keeps
    # v5e off its single store slot).  The store at the end of each sub-slab ends
    # the accumulator's live range.
    lo = 0
    while lo < v_t:
        width = min(v_sub, v_t - lo)
        # Lane-only iota: (1, width) int32, broadcast in the compare (saves ~n_t/8x
        # the vregs of a full [n_t, width] iota).
        v_iota = lax.broadcasted_iota(jnp.int32, (1, width), 1)
        src_sub = src0 if lo == 0 else src0 - lo                    # [n_t, S]

        acc = p_gen * vocab_ref[:, lo:lo + width].astype(jnp.float32)
        # Dense scatter_add along the lane axis.  S is small and static, so a full
        # unroll gives the LLO scheduler complete visibility; zero padding exists.
        # TODO(synk): for very long source sequences (S >> 256) switch this unroll
        # to a lax.fori_loop over fixed-size src chunks to bound code size.
        for j in range(S):
            acc = acc + jnp.where(src_sub[:, j:j + 1] == v_iota,
                                  attn_w[:, j:j + 1], 0.0)
        out_ref[:, lo:lo + width] = acc.astype(out_ref.dtype)
        lo += width


def copy_mechanism(context_vecs, hidden, trg_embs, vocab_dists, attn_dists,
                   src_ids, pad_id, *, w_h, w_s, w_x, b_x,
                   n_cap=64, v_cap=2048):
    # pad_id is accepted for signature parity with the PyTorch module but (like the
    # reference forward) does not participate in the compute.
    del pad_id
    B, T, H = context_vecs.shape
    V = vocab_dists.shape[-1]
    S = attn_dists.shape[-1]
    N = B * T
    out_dtype = vocab_dists.dtype

    # ---- p_gen in XLA: three matvecs on the original [B,T,H] tensors (no concat
    # copy), then flatten to [N, 1].  Negligible vs. the scatter.
    gen = (context_vecs.astype(jnp.float32) @ jnp.asarray(w_h, jnp.float32)
           + hidden.astype(jnp.float32) @ jnp.asarray(w_s, jnp.float32)
           + trg_embs.astype(jnp.float32) @ jnp.asarray(w_x, jnp.float32)
           + jnp.asarray(b_x, jnp.float32))
    p_gen = jax.nn.sigmoid(gen).reshape(N, 1)                       # [N, 1] f32

    # ---- flatten batch*time onto the sublane axis.
    vocab2 = vocab_dists.reshape(N, V)
    attn2 = attn_dists.reshape(N, S)
    src2 = src_ids.reshape(N, S).astype(jnp.int32)

    # ---- tile selection: full extent when it fits, otherwise an aligned cap.
    n_cap = max(8, (n_cap // 8) * 8)
    v_cap = max(128, (v_cap // 128) * 128)
    n_tile = N if N <= n_cap else n_cap          # multiple of 8 (or full extent)
    v_tile = V if V <= v_cap else v_cap          # multiple of 128 (or full extent)

    n_grid = pl.cdiv(N, n_tile)
    v_grid = pl.cdiv(V, v_tile)
    # v7x megacore: if the row axis collapses to a single block, prefer an even
    # number of vocab tiles so both TensorCores get balanced work.
    if n_grid == 1 and v_grid > 1 and v_grid % 2 == 1:
        v_even = ((pl.cdiv(V, v_grid + 1) + 127) // 128) * 128
        if v_even >= 128:
            v_tile = v_even
            v_grid = pl.cdiv(V, v_tile)

    # ---- inner vocab sub-slab width: keep the live f32 accumulator at ~32 vregs.
    v_sub = max(128, ((32 * 1024) // n_tile) // 128 * 128)
    v_sub = min(v_sub, v_tile)

    grid = (n_grid, v_grid)

    # ---- explicit VMEM budget: double-buffered vocab in/out blocks + attn/src/p_gen
    # blocks.  Stays comfortably under the v7x 64 MiB per-core ceiling.
    in_b = jnp.dtype(vocab_dists.dtype).itemsize
    out_b = jnp.dtype(out_dtype).itemsize
    attn_b = jnp.dtype(attn_dists.dtype).itemsize
    step_bytes = (n_tile * v_tile * 2 * (in_b + out_b)
                  + 2 * n_tile * S * (attn_b + 4)
                  + 2 * n_tile * 4)
    vmem_limit = int(min(48 * 1024 * 1024, max(16 * 1024 * 1024, 4 * step_bytes)))

    kernel = functools.partial(_copy_scatter_kernel, v_sub=v_sub)

    out2 = pl.pallas_call(
        kernel,
        out_shape=jax.ShapeDtypeStruct((N, V), out_dtype),
        grid=grid,
        in_specs=[
            pl.BlockSpec((n_tile, 1), lambda n, v: (n, 0)),          # p_gen
            pl.BlockSpec((n_tile, v_tile), lambda n, v: (n, v)),     # vocab_dists
            pl.BlockSpec((n_tile, S), lambda n, v: (n, 0)),          # attn_dists
            pl.BlockSpec((n_tile, S), lambda n, v: (n, 0)),          # src_ids
        ],
        out_specs=pl.BlockSpec((n_tile, v_tile), lambda n, v: (n, v)),
        compiler_params=pltpu.CompilerParams(
            dimension_semantics=("parallel", "parallel"),
            vmem_limit_bytes=vmem_limit),
    )(p_gen, vocab2, attn2, src2)

    return out2.reshape(B, T, V)


def _reference(context_vecs, hidden, trg_embs, vocab_dists, attn_dists,
               src_ids, w_h, w_s, w_x, b_x):
    gen = (context_vecs @ w_h[:, None] + hidden @ w_s[:, None]
           + trg_embs @ w_x[:, None] + b_x)
    p_gen = jax.nn.sigmoid(gen)
    vd = p_gen * vocab_dists
    ad = (1.0 - p_gen) * attn_dists
    V = vocab_dists.shape[-1]
    onehot = jax.nn.one_hot(src_ids, V, dtype=jnp.float32)
    return vd + jnp.einsum("bts,btsv->btv", ad, onehot)


if __name__ == "__main__":
    def run_case(B, T, H, V, S, seed):
        key = jax.random.PRNGKey(seed)
        ks = jax.random.split(key, 10)
        context_vecs = jax.random.normal(ks[0], (B, T, H), jnp.float32)
        hidden = jax.random.normal(ks[1], (B, T, H), jnp.float32)
        trg_embs = jax.random.normal(ks[2], (B, T, H), jnp.float32)
        vocab_dists = jax.nn.softmax(
            jax.random.normal(ks[3], (B, T, V), jnp.float32), axis=-1)
        attn_dists = jax.nn.softmax(
            jax.random.normal(ks[4], (B, T, S), jnp.float32), axis=-1)
        src_ids = jax.random.randint(ks[5], (B, T, S), 0, V, jnp.int32)

        # Deterministic xavier-uniform-style init for the Linear(H, 1) weights.
        bound = (6.0 / (H + 1)) ** 0.5
        w_h = jax.random.uniform(ks[6], (H,), jnp.float32, -bound, bound)
        w_s = jax.random.uniform(ks[7], (H,), jnp.float32, -bound, bound)
        w_x = jax.random.uniform(ks[8], (H,), jnp.float32, -bound, bound)
        b_bound = 1.0 / (H ** 0.5)
        b_x = jax.random.uniform(ks[9], (), jnp.float32, -b_bound, b_bound)

        out = copy_mechanism(context_vecs, hidden, trg_embs, vocab_dists,
                             attn_dists, src_ids, 0,
                             w_h=w_h, w_s=w_s, w_x=w_x, b_x=b_x)
        out = jax.block_until_ready(out)

        ref = _reference(context_vecs, hidden, trg_embs, vocab_dists, attn_dists,
                         src_ids, w_h, w_s, w_x, b_x)
        assert out.shape == (B, T, V)
        assert jnp.allclose(out, ref, atol=1e-5, rtol=1e-5), \
            f"mismatch vs reference at B={B} T={T} V={V} S={S}"

    # Tiny shape implied by the module spec: collapses to a single grid step.
    run_case(B=2, T=8, H=32, V=128, S=8, seed=0)
    # Larger shape exercising row/vocab tiling, vocab edge block and inner sub-slabs.
    run_case(B=2, T=32, H=32, V=3072, S=40, seed=1)
    print("KERNEL_OK")
</pallas_src>

<mosaic_0001>
module attributes {stable_mosaic.version = 11 : i64} {
  func.func @_copy_scatter_kernel(%arg0: i32, %arg1: i32, %arg2: memref<16x1xf32, #tpu.memory_space<vmem>>, %arg3: memref<16x128xf32, #tpu.memory_space<vmem>>, %arg4: memref<16x8xf32, #tpu.memory_space<vmem>>, %arg5: memref<16x8xi32, #tpu.memory_space<vmem>>, %arg6: memref<16x128xf32, #tpu.memory_space<vmem>>) attributes {dimension_semantics = [#tpu.dimension_semantics<parallel>, #tpu.dimension_semantics<parallel>], iteration_bounds = array<i64: 1, 1>, scalar_prefetch = 0 : i64, scratch_operands = 0 : i64, tpu.core_type = #tpu.core_type<tc>, window_params = [{transform_indices = @transform_0, window_bounds = array<i64: 16, 1>}, {transform_indices = @transform_1, window_bounds = array<i64: 16, 128>}, {transform_indices = @transform_2, window_bounds = array<i64: 16, 8>}, {transform_indices = @transform_3, window_bounds = array<i64: 16, 8>}, {transform_indices = @transform_4, window_bounds = array<i64: 16, 128>}]} {
    %c128_i32 = arith.constant 128 : i32
    %0 = arith.muli %arg1, %c128_i32 : i32
    %c0 = arith.constant 0 : index
    %c0_0 = arith.constant 0 : index
    %1 = vector.load %arg2[%c0, %c0_0] : memref<16x1xf32, #tpu.memory_space<vmem>>, vector<16x1xf32>
    %cst = arith.constant 1.000000e+00 : f32
    %2 = vector.broadcast %cst : f32 to vector<16x1xf32>
    %3 = arith.subf %2, %1 : vector<16x1xf32>
    %c0_1 = arith.constant 0 : index
    %c0_2 = arith.constant 0 : index
    %4 = vector.load %arg4[%c0_1, %c0_2] : memref<16x8xf32, #tpu.memory_space<vmem>>, vector<16x8xf32>
    %5 = vector.broadcast %3 : vector<16x1xf32> to vector<16x8xf32>
    %6 = arith.mulf %5, %4 : vector<16x8xf32>
    %c0_3 = arith.constant 0 : index
    %c0_4 = arith.constant 0 : index
    %7 = vector.load %arg5[%c0_3, %c0_4] : memref<16x8xi32, #tpu.memory_space<vmem>>, vector<16x8xi32>
    %8 = vector.broadcast %0 : i32 to vector<16x8xi32>
    %9 = arith.subi %7, %8 : vector<16x8xi32>
    %10 = tpu.iota {dimensions = array<i32: 1>} : vector<1x128xi32>
    %c0_5 = arith.constant 0 : index
    %c0_6 = arith.constant 0 : index
    %11 = vector.load %arg3[%c0_5, %c0_6] : memref<16x128xf32, #tpu.memory_space<vmem>>, vector<16x128xf32>
    %12 = vector.broadcast %1 : vector<16x1xf32> to vector<16x128xf32>
    %13 = arith.mulf %12, %11 : vector<16x128xf32>
    %14 = vector.extract_strided_slice %9 {offsets = [0, 0], sizes = [16, 1], strides = [1, 1]} : vector<16x8xi32> to vector<16x1xi32>
    %15 = vector.broadcast %14 : vector<16x1xi32> to vector<16x128xi32>
    %16 = vector.broadcast %10 : vector<1x128xi32> to vector<16x128xi32>
    %17 = arith.cmpi eq, %15, %16 : vector<16x128xi32>
    %18 = vector.extract_strided_slice %6 {offsets = [0, 0], sizes = [16, 1], strides = [1, 1]} : vector<16x8xf32> to vector<16x1xf32>
    %cst_7 = arith.constant 0.000000e+00 : f32
    %19 = vector.shape_cast %18 : vector<16x1xf32> to vector<16x1xf32>
    %20 = vector.broadcast %19 : vector<16x1xf32> to vector<16x128xf32>
    %21 = vector.broadcast %cst_7 : f32 to vector<16x128xf32>
    %22 = arith.select %17, %20, %21 : vector<16x128xi1>, vector<16x128xf32>
    %23 = arith.addf %13, %22 : vector<16x128xf32>
    %24 = vector.extract_strided_slice %9 {offsets = [0, 1], sizes = [16, 1], strides = [1, 1]} : vector<16x8xi32> to vector<16x1xi32>
    %25 = vector.broadcast %24 : vector<16x1xi32> to vector<16x128xi32>
    %26 = vector.broadcast %10 : vector<1x128xi32> to vector<16x128xi32>
    %27 = arith.cmpi eq, %25, %26 : vector<16x128xi32>
    %28 = vector.extract_strided_slice %6 {offsets = [0, 1], sizes = [16, 1], strides = [1, 1]} : vector<16x8xf32> to vector<16x1xf32>
    %cst_8 = arith.constant 0.000000e+00 : f32
    %29 = vector.shape_cast %28 : vector<16x1xf32> to vector<16x1xf32>
    %30 = vector.broadcast %29 : vector<16x1xf32> to vector<16x128xf32>
    %31 = vector.broadcast %cst_8 : f32 to vector<16x128xf32>
    %32 = arith.select %27, %30, %31 : vector<16x128xi1>, vector<16x128xf32>
    %33 = arith.addf %23, %32 : vector<16x128xf32>
    %34 = vector.extract_strided_slice %9 {offsets = [0, 2], sizes = [16, 1], strides = [1, 1]} : vector<16x8xi32> to vector<16x1xi32>
    %35 = vector.broadcast %34 : vector<16x1xi32> to vector<16x128xi32>
    %36 = vector.broadcast %10 : vector<1x128xi32> to vector<16x128xi32>
    %37 = arith.cmpi eq, %35, %36 : vector<16x128xi32>
    %38 = vector.extract_strided_slice %6 {offsets = [0, 2], sizes = [16, 1], strides = [1, 1]} : vector<16x8xf32> to vector<16x1xf32>
    %cst_9 = arith.constant 0.000000e+00 : f32
    %39 = vector.shape_cast %38 : vector<16x1xf32> to vector<16x1xf32>
    %40 = vector.broadcast %39 : vector<16x1xf32> to vector<16x128xf32>
    %41 = vector.broadcast %cst_9 : f32 to vector<16x128xf32>
    %42 = arith.select %37, %40, %41 : vector<16x128xi1>, vector<16x128xf32>
    %43 = arith.addf %33, %42 : vector<16x128xf32>
    %44 = vector.extract_strided_slice %9 {offsets = [0, 3], sizes = [16, 1], strides = [1, 1]} : vector<16x8xi32> to vector<16x1xi32>
    %45 = vector.broadcast %44 : vector<16x1xi32> to vector<16x128xi32>
    %46 = vector.broadcast %10 : vector<1x128xi32> to vector<16x128xi32>
    %47 = arith.cmpi eq, %45, %46 : vector<16x128xi32>
    %48 = vector.extract_strided_slice %6 {offsets = [0, 3], sizes = [16, 1], strides = [1, 1]} : vector<16x8xf32> to vector<16x1xf32>
    %cst_10 = arith.constant 0.000000e+00 : f32
    %49 = vector.shape_cast %48 : vector<16x1xf32> to vector<16x1xf32>
    %50 = vector.broadcast %49 : vector<16x1xf32> to vector<16x128xf32>
    %51 = vector.broadcast %cst_10 : f32 to vector<16x128xf32>
    %52 = arith.select %47, %50, %51 : vector<16x128xi1>, vector<16x128xf32>
    %53 = arith.addf %43, %52 : vector<16x128xf32>
    %54 = vector.extract_strided_slice %9 {offsets = [0, 4], sizes = [16, 1], strides = [1, 1]} : vector<16x8xi32> to vector<16x1xi32>
    %55 = vector.broadcast %54 : vector<16x1xi32> to vector<16x128xi32>
    %56 = vector.broadcast %10 : vector<1x128xi32> to vector<16x128xi32>
    %57 = arith.cmpi eq, %55, %56 : vector<16x128xi32>
    %58 = vector.extract_strided_slice %6 {offsets = [0, 4], sizes = [16, 1], strides = [1, 1]} : vector<16x8xf32> to vector<16x1xf32>
    %cst_11 = arith.constant 0.000000e+00 : f32
    %59 = vector.shape_cast %58 : vector<16x1xf32> to vector<16x1xf32>
    %60 = vector.broadcast %59 : vector<16x1xf32> to vector<16x128xf32>
    %61 = vector.broadcast %cst_11 : f32 to vector<16x128xf32>
    %62 = arith.select %57, %60, %61 : vector<16x128xi1>, vector<16x128xf32>
    %63 = arith.addf %53, %62 : vector<16x128xf32>
    %64 = vector.extract_strided_slice %9 {offsets = [0, 5], sizes = [16, 1], strides = [1, 1]} : vector<16x8xi32> to vector<16x1xi32>
    %65 = vector.broadcast %64 : vector<16x1xi32> to vector<16x128xi32>
    %66 = vector.broadcast %10 : vector<1x128xi32> to vector<16x128xi32>
    %67 = arith.cmpi eq, %65, %66 : vector<16x128xi32>
    %68 = vector.extract_strided_slice %6 {offsets = [0, 5], sizes = [16, 1], strides = [1, 1]} : vector<16x8xf32> to vector<16x1xf32>
    %cst_12 = arith.constant 0.000000e+00 : f32
    %69 = vector.shape_cast %68 : vector<16x1xf32> to vector<16x1xf32>
    %70 = vector.broadcast %69 : vector<16x1xf32> to vector<16x128xf32>
    %71 = vector.broadcast %cst_12 : f32 to vector<16x128xf32>
    %72 = arith.select %67, %70, %71 : vector<16x128xi1>, vector<16x128xf32>
    %73 = arith.addf %63, %72 : vector<16x128xf32>
    %74 = vector.extract_strided_slice %9 {offsets = [0, 6], sizes = [16, 1], strides = [1, 1]} : vector<16x8xi32> to vector<16x1xi32>
    %75 = vector.broadcast %74 : vector<16x1xi32> to vector<16x128xi32>
    %76 = vector.broadcast %10 : vector<1x128xi32> to vector<16x128xi32>
    %77 = arith.cmpi eq, %75, %76 : vector<16x128xi32>
    %78 = vector.extract_strided_slice %6 {offsets = [0, 6], sizes = [16, 1], strides = [1, 1]} : vector<16x8xf32> to vector<16x1xf32>
    %cst_13 = arith.constant 0.000000e+00 : f32
    %79 = vector.shape_cast %78 : vector<16x1xf32> to vector<16x1xf32>
    %80 = vector.broadcast %79 : vector<16x1xf32> to vector<16x128xf32>
    %81 = vector.broadcast %cst_13 : f32 to vector<16x128xf32>
    %82 = arith.select %77, %80, %81 : vector<16x128xi1>, vector<16x128xf32>
    %83 = arith.addf %73, %82 : vector<16x128xf32>
    %84 = vector.extract_strided_slice %9 {offsets = [0, 7], sizes = [16, 1], strides = [1, 1]} : vector<16x8xi32> to vector<16x1xi32>
    %85 = vector.broadcast %84 : vector<16x1xi32> to vector<16x128xi32>
    %86 = vector.broadcast %10 : vector<1x128xi32> to vector<16x128xi32>
    %87 = arith.cmpi eq, %85, %86 : vector<16x128xi32>
    %88 = vector.extract_strided_slice %6 {offsets = [0, 7], sizes = [16, 1], strides = [1, 1]} : vector<16x8xf32> to vector<16x1xf32>
    %cst_14 = arith.constant 0.000000e+00 : f32
    %89 = vector.shape_cast %88 : vector<16x1xf32> to vector<16x1xf32>
    %90 = vector.broadcast %89 : vector<16x1xf32> to vector<16x128xf32>
    %91 = vector.broadcast %cst_14 : f32 to vector<16x128xf32>
    %92 = arith.select %87, %90, %91 : vector<16x128xi1>, vector<16x128xf32>
    %93 = arith.addf %83, %92 : vector<16x128xf32>
    %c0_15 = arith.constant 0 : index
    %c0_16 = arith.constant 0 : index
    %94 = vector.load %arg6[%c0_15, %c0_16] : memref<16x128xf32, #tpu.memory_space<vmem>>, vector<16x128xf32>
    tpu.vector_store %arg6[%c0_15, %c0_16], %93 {strides = array<i32>} : memref<16x128xf32, #tpu.memory_space<vmem>>, vector<16x128xf32>,
    return
  }
  func.func @transform_0(%arg0: i32, %arg1: i32) -> (i32, i32) {
    %c0_i32 = arith.constant 0 : i32
    %c0_i32_0 = arith.constant 0 : i32
    return %arg0, %c0_i32 : i32, i32
  }
  func.func @transform_1(%arg0: i32, %arg1: i32) -> (i32, i32) {
    %c0_i32 = arith.constant 0 : i32
    return %arg0, %arg1 : i32, i32
  }
  func.func @transform_2(%arg0: i32, %arg1: i32) -> (i32, i32) {
    %c0_i32 = arith.constant 0 : i32
    %c0_i32_0 = arith.constant 0 : i32
    return %arg0, %c0_i32 : i32, i32
  }
  func.func @transform_3(%arg0: i32, %arg1: i32) -> (i32, i32) {
    %c0_i32 = arith.constant 0 : i32
    %c0_i32_0 = arith.constant 0 : i32
    return %arg0, %c0_i32 : i32, i32
  }
  func.func @transform_4(%arg0: i32, %arg1: i32) -> (i32, i32) {
    %c0_i32 = arith.constant 0 : i32
    return %arg0, %arg1 : i32, i32
  }
}

</mosaic_0001>

<bundles_post_ra>
// kernel: tpu_custom_call.1
= control target key start
LH: loop header
LB: loop body
LE: loop exit
PB: predicated region body
PF: predicated region fallthrough
CT: control target
= control target key end

     0   :  { %v309_v1 = vmov 1   ;;  %v310_v3 = vmov 0   ;;  %s427_s0 = inlined_call_operand.vmem [shape: f32[16,1], index: 0, kind: input, shape index: {}]   ;;  %s428_s1 = inlined_call_operand.vmem [shape: f32[16,128], index: 1, kind: input, shape index: {}]   ;;  %s429_s2 = inlined_call_operand.vmem [shape: f32[16,8], index: 2, kind: input, shape index: {}]   ;;  %s430_s3 = inlined_call_operand.vmem [shape: s32[16,8], index: 3, kind: input, shape index: {}]   ;;  %s431_s4 = inlined_call_operand.hbm [shape: f32[16,128], index: 4, kind: output, shape index: {}]  }
   0x1   :  { %v348_v0 = vld [vmem:[%s430_s3 + $0x8] sm:$0xff]  ;;  %254 = vset.pattern.permute.xlu0 %v309_v1  ;;  %v19_v2 = vld [vmem:[%s427_s0] sm:$0xff]  ;;  %251 = vset.pattern.permute.xlu1 %v310_v3 }
   0x2   :  { %9 = vsyncpa [#allocation3], 0  ;;  %84 = vperm.xlu0 %254, %v348_v0   ;;  %48 = vperm.xlu1 %251, %v19_v2   ;;  %v37_v4 = vld [vmem:[%s430_s3] sm:$0xff]  ;;  %v20_v5 = vld [vmem:[%s427_s0 + $0x8] sm:$0xff]  ;;  %v311_v6 = vmov 5   ;;  %v312_v7 = vmov 2   ;;  %v42_v35 = vlaneseq }
   0x3   :  { %252 = vset.pattern.permute.xlu2 %v310_v3  ;;  %v313_v8 = vmov 6   ;;  %v21_v9 = vsub.f32 1.0, %v19_v2  ;;  %v22_v10 = vsub.f32 1.0, %v20_v5  ;;  %v314_v11 = vmov 3   ;;  %v23_v17 = vld [vmem:[%s429_s2] sm:$0xff]  ;;  %v24_v20 = vld [vmem:[%s429_s2 + $0x8] sm:$0xff] }
   0x4   :  { %59 = vperm.xlu2 %252, %v37_v4   ;;  %v315_v12 = vmov 4   ;;  %v316_v13 = vmov 7   ;;  %v44_v37 = vld [vmem:[%s428_s1] sm:$0xff]  ;;  %v396_v38 = vand.u32 127, %v42_v35  ;;  %v45_v44 = vld [vmem:[%s428_s1 + $0x8] sm:$0xff]  ;;  %s317_s1 = smov [#allocation2]  }
   0x5   :  { %s226_s28 = sshll.u32 %s317_s1, 4  ;;  %s228_s5 = sshll.u32 %s431_s4, 4  ;;  %s227_s28 = int_to_ptr.vmem [resolvable:$true] %s226_s28  ;;  %s229_s5 = int_to_ptr.hbm [resolvable:$true] %s228_s5 }
   0x6   :  { %s318_s6 = smov 128   ;;  %s319_s7 = smov 8  }
   0xa   :  { %261 = vset.pattern.permute.xlu0 %v311_v6  ;;  %53 = vperm.xlu1 %251, %v20_v5  }
   0xb   :  { %161 = vperm.xlu0 %261, %v37_v4  }
   0xc   :  { %62 = vperm.xlu2 %252, %v348_v0  }
  0x12   :  { %255 = vset.pattern.permute.xlu1 %v312_v7 }
  0x13   :  { %264 = vset.pattern.permute.xlu0 %v313_v8  ;;  %101 = vperm.xlu1 %255, %v37_v4  }
  0x14   :  { %184 = vperm.xlu0 %264, %v348_v0   ;;  %253 = vset.pattern.permute.xlu2 %v309_v1 }
  0x15   :  { %81 = vperm.xlu2 %253, %v37_v4  }
  0x1b   :  { %258 = vset.pattern.permute.xlu1 %v314_v11 }
  0x1c   :  { %265 = vset.pattern.permute.xlu0 %v310_v3  ;;  %124 = vperm.xlu1 %258, %v348_v0  }
  0x1d   :  { %27 = vperm.xlu0 %265, %v21_v9   ;;  %256 = vset.pattern.permute.xlu2 %v312_v7 }
  0x1e   :  { %104 = vperm.xlu2 %256, %v348_v0  }
  0x24   :  { %259 = vset.pattern.permute.xlu1 %v315_v12 }
  0x25   :  { %32 = vperm.xlu0 %265, %v22_v10   ;;  %141 = vperm.xlu1 %259, %v37_v4  }
  0x26   :  { %257 = vset.pattern.permute.xlu2 %v314_v11 }
  0x27   :  { %121 = vperm.xlu2 %257, %v37_v4  }
  0x2d   :  { %262 = vset.pattern.permute.xlu1 %v311_v6 }
  0x2e   :  { %164 = vperm.xlu1 %262, %v348_v0  }
  0x2f   :  { %260 = vset.pattern.permute.xlu2 %v315_v12 }
  0x30   :  { %144 = vperm.xlu2 %260, %v348_v0  }
  0x36   :  { %266 = vset.pattern.permute.xlu1 %v316_v13 }
  0x37   :  { %201 = vperm.xlu1 %266, %v37_v4  }
  0x38   :  { %263 = vset.pattern.permute.xlu2 %v313_v8 }
  0x39   :  { %181 = vperm.xlu2 %263, %v37_v4  }
  0x3f   :  { %267 = vset.pattern.permute.xlu1 %v310_v3 }
  0x41   :  { %269 = vset.pattern.permute.xlu2 %v309_v1 }
  0x5e   :  { %v60_v23 = vpop.permute.xlu2 %59 }
  0x5f   :  { %vm64_vm0 = vcmp.eq.s32.totalorder %v60_v23, %v396_v38 }
  0x66   :  { %v63_v25 = vpop.permute.xlu2 %62 }
  0x67   :  { %vm65_vm1 = vcmp.eq.s32.totalorder %v63_v25, %v396_v38 }
  0x6f   :  { %v82_v27 = vpop.permute.xlu2 %81 }
  0x70   :  { %vm86_vm3 = vcmp.eq.s32.totalorder %v82_v27, %v396_v38 }
  0x74   :  { %v373_v14 = vpop.permute.xlu0 %84  ;;  %v49_v24 = vpop.permute.xlu1 %48 }
  0x75   :  { %v56_v40 = vmul.f32 %v49_v24, %v44_v37  ;;  %vm87_vm2 = vcmp.eq.s32.totalorder %v373_v14, %v396_v38 }
  0x78   :  { %v105_v29 = vpop.permute.xlu2 %104 }
  0x79   :  { %vm107_vm5 = vcmp.eq.s32.totalorder %v105_v29, %v396_v38 }
  0x7c   :  { %v54_v26 = vpop.permute.xlu1 %53 }
  0x7d   :  { %v375_v15 = vpop.permute.xlu0 %161  ;;  %v57_v46 = vmul.f32 %v54_v26, %v45_v44 }
  0x7e   :  { %vm166_vm9 = vcmp.eq.s32.totalorder %v375_v15, %v396_v38 }
  0x81   :  { %v122_v31 = vpop.permute.xlu2 %121 }
  0x82   :  { %vm126_vm7 = vcmp.eq.s32.totalorder %v122_v31, %v396_v38 }
  0x85   :  { %v102_v28 = vpop.permute.xlu1 %101 }
  0x86   :  { %v377_v16 = vpop.permute.xlu0 %184  ;;  %vm106_vm4 = vcmp.eq.s32.totalorder %v102_v28, %v396_v38 }
  0x87   :  { %vm187_vm12 = vcmp.eq.s32.totalorder %v377_v16, %v396_v38 }
  0x8a   :  { %v145_v33 = vpop.permute.xlu2 %144 }
  0x8b   :  { %vm147_vm10 = vcmp.eq.s32.totalorder %v145_v33, %v396_v38 }
  0x8e   :  { %v125_v30 = vpop.permute.xlu1 %124 }
  0x8f   :  { %v28_v18 = vpop.permute.xlu0 %27  ;;  %vm127_vm6 = vcmp.eq.s32.totalorder %v125_v30, %v396_v38 }
  0x90   :  { %v35_v19 = vmul.f32 %v28_v18, %v23_v17 }
  0x92   :  { %68 = vperm.xlu0 %265, %v35_v19  }
  0x93   :  { %v391_v36 = vpop.permute.xlu2 %181 }
  0x94   :  { %vm186_vm13 = vcmp.eq.s32.totalorder %v391_v36, %v396_v38 }
  0x97   :  { %v33_v21 = vpop.permute.xlu0 %32  ;;  %v142_v32 = vpop.permute.xlu1 %141 }
  0x98   :  { %v36_v22 = vmul.f32 %v33_v21, %v24_v20  ;;  %vm146_vm8 = vcmp.eq.s32.totalorder %v142_v32, %v396_v38 }
  0x9a   :  { %270 = vset.pattern.permute.xlu0 %v312_v7  ;;  %93 = vperm.xlu2 %269, %v36_v22  }
  0x9b   :  { %73 = vperm.xlu1 %267, %v36_v22   ;;  %109 = vperm.xlu0 %270, %v35_v19  }
  0xa0   :  { %v165_v34 = vpop.permute.xlu1 %164 }
  0xa1   :  { %vm167_vm11 = vcmp.eq.s32.totalorder %v165_v34, %v396_v38 }
  0xa2   :  { %272 = vset.pattern.permute.xlu2 %v314_v11 }
  0xa3   :  { %268 = vset.pattern.permute.xlu1 %v309_v1  ;;  %273 = vset.pattern.permute.xlu0 %v314_v11 }
  0xa4   :  { %129 = vperm.xlu2 %272, %v35_v19   ;;  %89 = vperm.xlu1 %268, %v35_v19  }
  0xa5   :  { %133 = vperm.xlu0 %273, %v36_v22  }
  0xa9   :  { %v398_v39 = vpop.permute.xlu1 %201 }
  0xaa   :  { %vm206_vm14 = vcmp.eq.s32.totalorder %v398_v39, %v396_v38 }
  0xac   :  { %275 = vset.pattern.permute.xlu2 %v315_v12  ;;  %271 = vset.pattern.permute.xlu1 %v312_v7 }
  0xad   :  { %281 = vset.pattern.permute.xlu0 %v316_v13  ;;  %153 = vperm.xlu2 %275, %v36_v22  }
  0xae   :  { %113 = vperm.xlu1 %271, %v36_v22   ;;  %209 = vperm.xlu0 %281, %v35_v19  }
  0xb5   :  { %276 = vset.pattern.permute.xlu2 %v311_v6 }
  0xb6   :  { %274 = vset.pattern.permute.xlu1 %v315_v12  ;;  %169 = vperm.xlu2 %276, %v35_v19  }
  0xb7   :  { %149 = vperm.xlu1 %274, %v35_v19  }
  0xbe   :  { %279 = vset.pattern.permute.xlu2 %v313_v8 }
  0xbf   :  { %277 = vset.pattern.permute.xlu1 %v311_v6  ;;  %193 = vperm.xlu2 %279, %v36_v22  }
  0xc0   :  { %173 = vperm.xlu1 %277, %v36_v22  }
  0xc7   :  { %280 = vset.pattern.permute.xlu2 %v316_v13 }
  0xc8   :  { %278 = vset.pattern.permute.xlu1 %v313_v8  ;;  %204 = vperm.xlu2 %280, %v348_v0  }
  0xc9   :  { %189 = vperm.xlu1 %278, %v35_v19  }
  0xd1   :  { %282 = vset.pattern.permute.xlu1 %v316_v13 }
  0xd2   :  { %213 = vperm.xlu1 %282, %v36_v22  }
  0xf4   :  { %v94_v45 = vpop.permute.xlu2 %93 }
  0xf5   :  { %v97_v50 = vsel %vm87_vm2, %v94_v45, 0.0 }
  0xfe   :  { %v130_v52 = vpop.permute.xlu2 %129 }
  0xff   :  { %v136_v2 = vsel %vm126_vm7, %v130_v52, 0.0 }
 0x104   :  { %v69_v41 = vpop.permute.xlu0 %68 }
 0x105   :  { %v76_v42 = vsel %vm64_vm0, %v69_v41, 0.0 }
 0x106   :  { %v78_v43 = vadd.f32 %v76_v42, %v56_v40 }
 0x107   :  { %v154_v59 = vpop.permute.xlu2 %153 }
 0x108   :  { %v157_v10 = vsel %vm147_vm10, %v154_v59, 0.0 }
 0x10d   :  { %v74_v47 = vpop.permute.xlu1 %73  ;;  %v110_v53 = vpop.permute.xlu0 %109 }
 0x10e   :  { %v77_v48 = vsel %vm65_vm1, %v74_v47, 0.0  ;;  %v116_v57 = vsel %vm106_vm4, %v110_v53, 0.0 }
 0x10f   :  { %v79_v49 = vadd.f32 %v77_v48, %v57_v46 }
 0x110   :  { %v170_v3 = vpop.permute.xlu2 %169 }
 0x111   :  { %v99_v51 = vadd.f32 %v97_v50, %v79_v49  ;;  %v176_v8 = vsel %vm166_vm9, %v170_v3, 0.0 }
 0x116   :  { %v90_v54 = vpop.permute.xlu1 %89 }
 0x117   :  { %v96_v55 = vsel %vm86_vm3, %v90_v54, 0.0  ;;  %v134_v60 = vpop.permute.xlu0 %133 }
 0x118   :  { %v98_v56 = vadd.f32 %v96_v55, %v78_v43  ;;  %v137_v0 = vsel %vm127_vm6, %v134_v60, 0.0 }
 0x119   :  { %v194_v11 = vpop.permute.xlu2 %193 }
 0x11a   :  { %v118_v58 = vadd.f32 %v116_v57, %v98_v56  ;;  %v197_v18 = vsel %vm187_vm12, %v194_v11, 0.0 }
 0x11c   :  { %v138_v5 = vadd.f32 %v136_v2, %v118_v58 }
 0x120   :  { %v114_v61 = vpop.permute.xlu1 %113  ;;  %v210_v15 = vpop.permute.xlu0 %209 }
 0x121   :  { %v117_v62 = vsel %vm107_vm5, %v114_v61, 0.0  ;;  %v216_v23 = vsel %vm206_vm14, %v210_v15, 0.0 }
 0x122   :  { %v119_v63 = vadd.f32 %v117_v62, %v99_v51  ;;  %v205_v25 = vpop.permute.xlu2 %204 }
 0x123   :  { %vm207_vm15 = vcmp.eq.s32.totalorder %v205_v25, %v396_v38 }
 0x124   :  { %v139_v1 = vadd.f32 %v137_v0, %v119_v63 }
 0x126   :  { %v159_v13 = vadd.f32 %v157_v10, %v139_v1 }
 0x129   :  { %v150_v4 = vpop.permute.xlu1 %149 }
 0x12a   :  { %v156_v6 = vsel %vm146_vm8, %v150_v4, 0.0 }
 0x12b   :  { %v158_v7 = vadd.f32 %v156_v6, %v138_v5 }
 0x12d   :  { %v178_v9 = vadd.f32 %v176_v8, %v158_v7 }
 0x132   :  { %v174_v12 = vpop.permute.xlu1 %173 }
 0x133   :  { %v177_v14 = vsel %vm167_vm11, %v174_v12, 0.0 }
 0x134   :  { %v179_v17 = vadd.f32 %v177_v14, %v159_v13 }
 0x136   :  { %v199_v19 = vadd.f32 %v197_v18, %v179_v17 }
 0x13b   :  { %v190_v20 = vpop.permute.xlu1 %189 }
 0x13c   :  { %v196_v21 = vsel %vm186_vm13, %v190_v20, 0.0 }
 0x13d   :  { %v198_v22 = vadd.f32 %v196_v21, %v178_v9 }
 0x13f   :  { %v218_v24 = vadd.f32 %v216_v23, %v198_v22 }
 0x141   :  { %220 = vst [vmem:[#allocation2] sm:$0xff] %v218_v24 }
 0x144   :  { %v214_v16 = vpop.permute.xlu1 %213 }
 0x145   :  { %v217_v26 = vsel %vm207_vm15, %v214_v16, 0.0 }
 0x146   :  { %v219_v27 = vadd.f32 %v217_v26, %v199_v19 }
 0x148   :  { %221 = vst [vmem:[#allocation2 + $0x8] sm:$0xff] %v219_v27 }
 0x149   :  { %234 = dma.vmem_to_hbm [thread:$0]  %s227_s28, 256, %s229_s5, [#allocation3], %s318_s6, %s318_s6, %s319_s7  }
 0x14a   :  { %307 = dma.done.wait [#allocation3], 256  }
 0x14b   :  { %308 = vsyncadd [#allocation3], 4294967040 }
 0x14c   :  { %239 = vsyncpa [#allocation3], 1 }

</bundles_post_ra>
